<compile_context>
chip_gen: v7x
topology: tpu7x:2x2x1
jax: 0.10.0
libtpu: 0.0.40
codegen_flags: <defaults>
</compile_context>

<pallas_src>
import functools
import math

import jax
import jax.numpy as jnp
from jax.experimental import pallas as pl
from jax.experimental.pallas import tpu as pltpu

_LANES = 128
_BLOCK_ROWS = 4096                    # (4096,128) f32 tile = 2 MiB
_ACC_ROWS = 64                        # small (64,128) f32 accumulator = 32 KiB
_BLOCK_ELEMS = _BLOCK_ROWS * _LANES
_HALF_LOG_2PI = 0.5 * math.log(2.0 * math.pi)
_VMEM_LIMIT_BYTES = 32 * 1024 * 1024  # <= physical VMEM on v5e/v6e/v7x


def _elementwise_nll(mean, var, gt):
    """0.5*log(var) + (gt-mean)^2/(2*var); the 0.5*log(2*pi) constant is hoisted."""
    mean = mean.astype(jnp.float32)
    var = jnp.maximum(var.astype(jnp.float32), 1e-6)  # torch.clamp(min=1e-6)
    gt = gt.astype(jnp.float32)
    diff = gt - mean
    # Exact division: HBM-bound kernel, the extra EUP/VALU work is free.
    return 0.5 * jnp.log(var) + (diff * diff) / (2.0 * var)


def _gnll_single_kernel(mean_ref, var_ref, gt_ref, out_ref):
    # Gridless path (small inputs / the ragged tail): one VMEM-resident block,
    # straight-line reduce, no scratch.  Writes the raw partial SUM.
    nll = _elementwise_nll(mean_ref[...], var_ref[...], gt_ref[...])
    out_ref[...] = jnp.sum(nll, keepdims=True)


def _gnll_tiled_kernel(mean_ref, var_ref, gt_ref, out_ref, acc_ref, *, nb, bpc):
    c = pl.program_id(0)   # "core" axis (parallel; sharded across TCs on v7x)
    i = pl.program_id(1)   # streaming axis (arbitrary)

    @pl.when(i == 0)
    def _():
        acc_ref[...] = jnp.zeros_like(acc_ref)

    # Skip the duplicated (index-clamped) last block when nb is odd.
    @pl.when(c * bpc + i < nb)
    def _():
        nll = _elementwise_nll(mean_ref[...], var_ref[...], gt_ref[...])
        # Fold the (BLOCK_ROWS,128) tile onto the small accumulator: pure VALU
        # adds across vregs (layout-preserving leading-dim split), no XLU
        # reduce in the steady state, ~32 KiB of accumulator traffic per step.
        acc_ref[...] += nll.reshape(-1, _ACC_ROWS, _LANES).sum(axis=0)

    @pl.when(i == pl.num_programs(1) - 1)
    def _():
        # Per-core raw partial sum; wrapper adds partials, divides by the true
        # element count and adds the hoisted 0.5*log(2*pi).
        out_ref[0] = jnp.sum(acc_ref[...], keepdims=True)


def _round_up(x, m):
    return (x + m - 1) // m * m


def _pad_tail_slab(flat, rows, fill):
    pad = rows * _LANES - flat.size
    if pad:
        flat = jnp.concatenate([flat, jnp.full((pad,), fill, dtype=flat.dtype)])
    return flat.reshape(rows, _LANES)


def gaussian_nll_loss(mean_predictions, variance_predictions, ground_truth):
    """Pallas TPU implementation of GaussianNLLoss.forward (returns f32 scalar)."""
    assert (mean_predictions.shape == variance_predictions.shape == ground_truth.shape)
    n = mean_predictions.size

    m_flat = mean_predictions.reshape(-1)
    v_flat = variance_predictions.reshape(-1)
    g_flat = ground_truth.reshape(-1)

    nb = n // _BLOCK_ELEMS            # full tiles, consumed in place
    tail = n - nb * _BLOCK_ELEMS      # < one tile; only this gets a padded copy
    total = jnp.zeros((), jnp.float32)

    if nb:
        num_cores = 2 if nb >= 2 else 1      # v7x megacore split; harmless on 1-TC chips
        bpc = pl.cdiv(nb, num_cores)         # blocks per core
        main_rows = nb * _BLOCK_ROWS
        n_main = nb * _BLOCK_ELEMS
        m_main = m_flat[:n_main].reshape(main_rows, _LANES)
        v_main = v_flat[:n_main].reshape(main_rows, _LANES)
        g_main = g_flat[:n_main].reshape(main_rows, _LANES)

        def row_map(c, i):
            # Clamp core 1's (possibly) out-of-range last block when nb is odd;
            # the kernel skips its accumulation via pl.when.
            return (jnp.minimum(c * bpc + i, nb - 1), 0)

        in_spec = pl.BlockSpec((_BLOCK_ROWS, _LANES), row_map)
        partials = pl.pallas_call(
            functools.partial(_gnll_tiled_kernel, nb=nb, bpc=bpc),
            out_shape=jax.ShapeDtypeStruct((num_cores, 1, 1), jnp.float32),
            grid_spec=pltpu.PrefetchScalarGridSpec(
                num_scalar_prefetch=0,
                grid=(num_cores, bpc),
                in_specs=[in_spec, in_spec, in_spec],
                out_specs=pl.BlockSpec((1, 1, 1), lambda c, i: (c, 0, 0)),
                scratch_shapes=[pltpu.VMEM((_ACC_ROWS, _LANES), jnp.float32)],
            ),
            compiler_params=pltpu.CompilerParams(
                dimension_semantics=("parallel", "arbitrary"),
                vmem_limit_bytes=_VMEM_LIMIT_BYTES,
            ),
            cost_estimate=pl.CostEstimate(
                flops=6 * n_main,
                transcendentals=n_main,
                bytes_accessed=12 * n_main + 8 * num_cores,
            ),
        )(m_main, v_main, g_main)
        total = total + jnp.sum(partials)

    if tail:
        rows = _round_up(pl.cdiv(tail, _LANES), 8)   # sublane-aligned tail slab
        # Padding chosen so padded elements contribute exactly 0 to the sum:
        # mean=gt=0 -> diff^2 = 0, var=1 -> log(var) = 0.
        m_t = _pad_tail_slab(m_flat[nb * _BLOCK_ELEMS:], rows, 0)
        v_t = _pad_tail_slab(v_flat[nb * _BLOCK_ELEMS:], rows, 1)
        g_t = _pad_tail_slab(g_flat[nb * _BLOCK_ELEMS:], rows, 0)
        tail_sum = pl.pallas_call(
            _gnll_single_kernel,
            out_shape=jax.ShapeDtypeStruct((1, 1), jnp.float32),
        )(m_t, v_t, g_t)
        total = total + tail_sum[0, 0]

    # Mean over the TRUE element count, plus the hoisted 0.5*log(2*pi).
    return total / n + _HALF_LOG_2PI


if __name__ == "__main__":
    key = jax.random.PRNGKey(0)

    def _ref(mean, var, gt):
        v = jnp.maximum(var, 1e-6)
        return jnp.mean(0.5 * jnp.log(2.0 * jnp.pi * v) + (gt - mean) ** 2 / (2.0 * v))

    def _check(shape, k):
        k_m, k_v, k_g = jax.random.split(k, 3)
        mean_pred = jax.random.normal(k_m, shape, dtype=jnp.float32)
        # mix of positive and tiny/negative values to exercise the clamp
        var_pred = jax.random.uniform(k_v, shape, dtype=jnp.float32,
                                      minval=-0.1, maxval=1.0)
        gt = jax.random.normal(k_g, shape, dtype=jnp.float32)
        loss = jax.block_until_ready(gaussian_nll_loss(mean_pred, var_pred, gt))
        ref = _ref(mean_pred, var_pred, gt)
        assert jnp.allclose(loss, ref, rtol=1e-3, atol=1e-3), (shape, loss, ref)

    k0, k1, k2 = jax.random.split(key, 3)
    # Primary small demo shape (NCHW) -> gridless path.
    _check((2, 4, 16, 16), k0)
    # Tiled path: 2 full blocks (even -> both-TC split on v7x) + ragged tail.
    _check((2, 4, 384, 360), k1)
    # Odd number of full blocks (exercises the clamped/guarded last block) + tail.
    _check((3, 4, 368, 360), k2)

    print("KERNEL_OK")
</pallas_src>

<mosaic_0001>
module attributes {stable_mosaic.version = 11 : i64} {
  func.func @_gnll_single_kernel(%arg0: memref<16x128xf32, #tpu.memory_space<vmem>>, %arg1: memref<16x128xf32, #tpu.memory_space<vmem>>, %arg2: memref<16x128xf32, #tpu.memory_space<vmem>>, %arg3: memref<1x1xf32, #tpu.memory_space<vmem>>) attributes {dimension_semantics = [], scalar_prefetch = 0 : i64, scratch_operands = 0 : i64, tpu.core_type = #tpu.core_type<tc>} {
    %c0 = arith.constant 0 : index
    %c0_0 = arith.constant 0 : index
    %0 = vector.load %arg0[%c0, %c0_0] : memref<16x128xf32, #tpu.memory_space<vmem>>, vector<16x128xf32>
    %c0_1 = arith.constant 0 : index
    %c0_2 = arith.constant 0 : index
    %1 = vector.load %arg1[%c0_1, %c0_2] : memref<16x128xf32, #tpu.memory_space<vmem>>, vector<16x128xf32>
    %c0_3 = arith.constant 0 : index
    %c0_4 = arith.constant 0 : index
    %2 = vector.load %arg2[%c0_3, %c0_4] : memref<16x128xf32, #tpu.memory_space<vmem>>, vector<16x128xf32>
    %cst = arith.constant 9.99999997E-7 : f32
    %3 = vector.broadcast %cst : f32 to vector<16x128xf32>
    %4 = arith.maximumf %1, %3 : vector<16x128xf32>
    %5 = arith.subf %2, %0 : vector<16x128xf32>
    %6 = math.log %4 : vector<16x128xf32>
    %cst_5 = arith.constant 5.000000e-01 : f32
    %7 = vector.broadcast %cst_5 : f32 to vector<16x128xf32>
    %8 = arith.mulf %7, %6 : vector<16x128xf32>
    %9 = arith.mulf %5, %5 : vector<16x128xf32>
    %cst_6 = arith.constant 2.000000e+00 : f32
    %10 = vector.broadcast %cst_6 : f32 to vector<16x128xf32>
    %11 = arith.mulf %10, %4 : vector<16x128xf32>
    %12 = arith.divf %9, %11 : vector<16x128xf32>
    %13 = arith.addf %8, %12 : vector<16x128xf32>
    %14 = vector.shape_cast %13 : vector<16x128xf32> to vector<1x16x128xf32>
    %cst_7 = arith.constant dense<0.000000e+00> : vector<1xf32>
    %15 = vector.multi_reduction <add>, %14, %cst_7 [1, 2] : vector<1x16x128xf32> to vector<1xf32>
    %16 = vector.shape_cast %15 : vector<1xf32> to vector<1x1x1xf32>
    %17 = vector.extract %16[0, 0, 0] : f32 from vector<1x1x1xf32>
    %18 = vector.broadcast %17 : f32 to vector<1x1xf32>
    %c0_8 = arith.constant 0 : index
    %c0_9 = arith.constant 0 : index
    %19 = vector.load %arg3[%c0_8, %c0_9] : memref<1x1xf32, #tpu.memory_space<vmem>>, vector<1x1xf32>
    tpu.vector_store %arg3[%c0_8, %c0_9], %18 {strides = array<i32>} : memref<1x1xf32, #tpu.memory_space<vmem>>, vector<1x1xf32>,
    return
  }
}

</mosaic_0001>

<bundles_post_ra>
// kernel: tpu_custom_call.1
= control target key start
LH: loop header
LB: loop body
LE: loop exit
PB: predicated region body
PF: predicated region fallthrough
CT: control target
= control target key end

     0   :  { %8 = vsyncpa [#allocation3], 0  ;;  %s311_s0 = inlined_call_operand.hbm [shape: f32[16,128], index: 0, kind: input, shape index: {}]   ;;  %s312_s1 = inlined_call_operand.hbm [shape: f32[16,128], index: 1, kind: input, shape index: {}]   ;;  %s313_s2 = inlined_call_operand.hbm [shape: f32[16,128], index: 2, kind: input, shape index: {}]   ;;  %s314_s3 = inlined_call_operand.hbm [shape: f32[1,1], index: 3, kind: output, shape index: {}]  }
   0x1   :  { %9 = vsyncpa [#allocation6], 0 }
   0x2   :  { %10 = vsyncpa [#allocation4], 0  ;;  %s221_s12 = smov [#allocation5]   ;;  %s222_s14 = smov [#allocation2]  }
   0x3   :  { %s28_s13 = sshll.u32 %s221_s12, 4  ;;  %s16_s15 = sshll.u32 %s222_s14, 4  ;;  %s29_s13 = int_to_ptr.vmem [resolvable:$true] %s28_s13  ;;  %s247_s15 = int_to_ptr.vmem [resolvable:$true] %s16_s15 }
   0x4   :  { %s127_s18 = scalar_lea.hbm %s312_s1, 256 }
   0x5   :  { %p128_p0 = scmp.ne.s32.totalorder %s312_s1, %s127_s18  ;;  %p131_p1 = scmp.lt.u32.totalorder %s127_s18, %s312_s1 }
   0x7   :  { %p133_p2 = pnand %p131_p1, %p128_p0 }
   0x9   :  { %136 = shalt.err (!%p133_p2)
}
   0xa   :  { %s137_s23 = scalar_lea.vmem %s29_s13, 256  ;;  %p142_p4 = scmp.lt.s32.totalorder %s29_s13, %s29_s13 }
   0xb   :  { %p138_p3 = scmp.ne.s32.totalorder %s29_s13, %s137_s23  ;;  %p143_p5 = scmp.lt.s32.totalorder %s137_s23, %s137_s23 }
   0xd   :  { %p144_p6 = por %p143_p5, %p142_p4 }
   0xf   :  { %p145_p7 = pnand %p144_p6, %p138_p3 }
  0x11   :  { %148 = shalt.err (!%p145_p7)
}
  0x12   :  { %s223_s24 = smov 128   ;;  %s224_s25 = smov 8  }
  0x13   :  { %34 = dma.hbm_to_vmem [thread:$0]  %s312_s1, 256, %s29_s13, [#allocation6], %s223_s24, %s223_s24, %s224_s25  }
  0x14   :  { %s149_s30 = scalar_lea.hbm %s311_s0, 256 }
  0x15   :  { %p150_p8 = scmp.ne.s32.totalorder %s311_s0, %s149_s30  ;;  %p153_p9 = scmp.lt.u32.totalorder %s149_s30, %s311_s0 }
  0x17   :  { %p155_p10 = pnand %p153_p9, %p150_p8 }
  0x19   :  { %158 = shalt.err (!%p155_p10)
}
  0x1a   :  { %s159_s8 = scalar_lea.vmem %s247_s15, 256  ;;  %p164_p12 = scmp.lt.s32.totalorder %s247_s15, %s247_s15 }
  0x1b   :  { %p160_p11 = scmp.ne.s32.totalorder %s247_s15, %s159_s8  ;;  %p165_p13 = scmp.lt.s32.totalorder %s159_s8, %s159_s8 }
  0x1d   :  { %p166_p0 = por %p165_p13, %p164_p12 }
  0x1f   :  { %p167_p1 = pnand %p166_p0, %p160_p11 }
  0x21   :  { %170 = shalt.err (!%p167_p1)
}
  0x22   :  { %22 = dma.hbm_to_vmem [thread:$0]  %s311_s0, 256, %s247_s15, [#allocation3], %s223_s24, %s223_s24, %s224_s25  }
  0x23   :  { %s225_s10 = smov [#allocation7]   ;;  %s171_s14 = scalar_lea.hbm %s313_s2, 256 }
  0x24   :  { %s40_s11 = sshll.u32 %s225_s10, 4  ;;  %p172_p2 = scmp.ne.s32.totalorder %s313_s2, %s171_s14  ;;  %s41_s11 = int_to_ptr.vmem [resolvable:$true] %s40_s11 }
  0x25   :  { %p175_p3 = scmp.lt.u32.totalorder %s171_s14, %s313_s2 }
  0x27   :  { %p177_p4 = pnand %p175_p3, %p172_p2 }
  0x29   :  { %180 = shalt.err (!%p177_p4)
}
  0x2a   :  { %s181_s20 = scalar_lea.vmem %s41_s11, 256  ;;  %p186_p6 = scmp.lt.s32.totalorder %s41_s11, %s41_s11 }
  0x2b   :  { %p182_p5 = scmp.ne.s32.totalorder %s41_s11, %s181_s20  ;;  %p187_p7 = scmp.lt.s32.totalorder %s181_s20, %s181_s20 }
  0x2d   :  { %p188_p8 = por %p187_p7, %p186_p6 }
  0x2f   :  { %p189_p9 = pnand %p188_p8, %p182_p5 }
  0x31   :  { %192 = shalt.err (!%p189_p9)
}
  0x32   :  { %46 = dma.hbm_to_vmem [thread:$0]  %s313_s2, 256, %s41_s11, [#allocation6], %s223_s24, %s223_s24, %s224_s25  }
  0x33   :  { %215 = dma.done.wait [#allocation3], 256  }
  0x34   :  { %216 = vsyncadd [#allocation3], 4294967040 }
  0x35   :  { %217 = dma.done.wait [#allocation6], 512  }
  0x36   :  { %218 = vsyncadd [#allocation6], 4294966784  ;;  %v58_v0 = vld [vmem:[#allocation5] sm:$0xff]  ;;  %v59_v1 = vld [vmem:[#allocation5 + $0x8] sm:$0xff]  ;;  %s226_s2 = smov [#allocation8]   ;;  %vm93_vm0 = vcmask 0  }
  0x37   :  { %v62_v2 = vmax.f32 %v58_v0, 1e-06  ;;  %v63_v3 = vmax.f32 %v59_v1, 1e-06  ;;  %v56_v6 = vld [vmem:[#allocation2] sm:$0xff]  ;;  %v57_v8 = vld [vmem:[#allocation2 + $0x8] sm:$0xff] }
  0x38   :  { %v60_v7 = vld [vmem:[#allocation7] sm:$0xff]  ;;  %v61_v9 = vld [vmem:[#allocation7 + $0x8] sm:$0xff]  ;;  %s101_s21 = sshll.u32 %s226_s2, 4  ;;  %s102_s21 = int_to_ptr.vmem [resolvable:$true] %s101_s21 }
  0x39   :  { %119 = vlog2.f32 %v62_v2  ;;  %v74_v4 = vmul.f32 2.0, %v62_v2  ;;  %v75_v5 = vmul.f32 2.0, %v63_v3  ;;  %v64_v10 = vsub.f32 %v60_v7, %v56_v6  ;;  %s193_s23 = scalar_lea.vmem %s102_s21, 16  ;;  %s197_s24 = scalar_lea.vmem %s102_s21, 32 }
  0x3a   :  { %121 = vlog2.f32 %v63_v3  ;;  %v65_v11 = vsub.f32 %v61_v9, %v57_v8  ;;  %p194_p10 = scmp.ne.s32.totalorder %s102_s21, %s193_s23  ;;  %p198_p11 = scmp.lt.s32.totalorder %s102_s21, %s102_s21 }
  0x3b   :  { %123 = vrcp.f32 %v74_v4  ;;  %v72_v12 = vmul.f32 %v64_v10, %v64_v10  ;;  %p199_p12 = scmp.lt.s32.totalorder %s197_s24, %s193_s23 }
  0x3c   :  { %125 = vrcp.f32 %v75_v5  ;;  %v73_v14 = vmul.f32 %v65_v11, %v65_v11 }
  0x3d   :  { %p200_p13 = por %p199_p12, %p198_p11 }
  0x3f   :  { %p201_p0 = pnand %p200_p13, %p194_p10 }
  0x43   :  { %v120_v13 = vpop.eup %119 }
  0x44   :  { %v122_v15 = vpop.eup %121  ;;  %v67_v16 = vmul.f32 0.6931472, %v120_v13 }
  0x45   :  { %v124_v17 = vpop.eup %123  ;;  %v69_v18 = vmul.f32 0.6931472, %v122_v15 }
  0x46   :  { %v126_v19 = vpop.eup %125  ;;  %v70_v20 = vmul.f32 0.5, %v67_v16  ;;  %v77_v21 = vmul.f32 %v124_v17, %v72_v12 }
  0x47   :  { %v71_v22 = vmul.f32 0.5, %v69_v18  ;;  %v79_v23 = vmul.f32 %v126_v19, %v73_v14 }
  0x48   :  { %v80_v24 = vadd.f32 %v77_v21, %v70_v20 }
  0x49   :  { %v81_v25 = vadd.f32 %v79_v23, %v71_v22 }
  0x4b   :  { %v82_v26 = vadd.f32 %v81_v25, %v80_v24 }
  0x4d   :  { %83 = vadd.xlane.f32.xlu0 %v82_v26 }
  0xda   :  { %v84_v27 = vpop.xlane.xlu0 %83 }
  0xdb   :  { %v85_v28 = vrot.slane %v84_v27, 4 }
  0xdd   :  { %v86_v29 = vadd.f32 %v85_v28, %v84_v27 }
  0xdf   :  { %v87_v30 = vrot.slane %v86_v29, 2 }
  0xe1   :  { %v88_v31 = vadd.f32 %v87_v30, %v86_v29 }
  0xe3   :  { %v89_v32 = vrot.slane %v88_v31, 1 }
  0xe5   :  { %v90_v33 = vadd.f32 %v89_v32, %v88_v31 }
  0xe7   :  { %111 = vpush %v90_v33 }
 0x118   :  { %s112_s22 = spop %111 }
 0x119   :  { %v92_v34 = vstv %s112_s22 }
 0x11a   :  { %94 = vst.msk [vmem:[#allocation8] sm:$0x1] %vm93_vm0, %v92_v34 }
 0x11b   :  { %204 = shalt.err (!%p201_p0)
}
 0x11c   :  { %s205_s27 = scalar_lea.hbm %s314_s3, 16 }
 0x11d   :  { %p206_p1 = scmp.ne.s32.totalorder %s314_s3, %s205_s27  ;;  %p209_p2 = scmp.lt.u32.totalorder %s205_s27, %s314_s3 }
 0x11f   :  { %p211_p3 = pnand %p209_p2, %p206_p1 }
 0x121   :  { %214 = shalt.err (!%p211_p3)
}
 0x122   :  { %104 = dma.vmem_to_hbm [thread:$0]  %s102_s21, 16, %s314_s3, [#allocation4]  }
 0x123   :  { %219 = dma.done.wait [#allocation4], 16  }
 0x124   :  { %220 = vsyncadd [#allocation4], 4294967280 }
 0x125   :  { %108 = vsyncpa [#allocation3], 1 }
 0x126   :  { %109 = vsyncpa [#allocation6], 1 }
 0x127   :  { %110 = vsyncpa [#allocation4], 1 }

</bundles_post_ra>
